<compile_context>
chip_gen: v6e
topology: v6e:2x2x1
jax: 0.10.0
libtpu: 0.0.40
codegen_flags: <defaults>
</compile_context>

<pallas_src>
import jax
import jax.numpy as jnp
from jax.experimental import pallas as pl
from jax.experimental.pallas import tpu as pltpu

TEMPERATURE = 1.0


def _round_up(x, m):
    return ((x + m - 1) // m) * m


def _round_down(x, m):
    return (x // m) * m


def _tpu_generation():
    """Best-effort TPU generation from the device kind string (0 if unknown)."""
    try:
        kind = jax.devices()[0].device_kind.lower()
    except Exception:
        return 0
    for g in (7, 6, 5, 4):
        if str(g) in kind:
            return g
    return 0


def _make_kernel(*, batch, tile_rows, num_inner, temperature, alpha,
                 has_target, need_mask):
    """Builds the gridded kernel body (statics baked in via closure)."""

    def kernel(*refs):
        if has_target:
            out_ref, soft_ref, tgt_ref, loss_ref, kl_acc, ce_acc = refs
        else:
            out_ref, soft_ref, loss_ref, kl_acc = refs

        p = pl.program_id(0)      # partial-sum axis (per-TensorCore on v7x)
        i = pl.program_id(1)      # reduction axis over row tiles ("arbitrary")

        @pl.when(i == 0)
        def _init():
            kl_acc[...] = jnp.zeros_like(kl_acc)
            if has_target:
                ce_acc[...] = jnp.zeros_like(ce_acc)

        x = out_ref[...].astype(jnp.float32)    # [TB, C] student logits
        s = soft_ref[...].astype(jnp.float32)   # [TB, C] teacher logits

        # T is a compile-time constant (1.0 for this module): skip tempering
        # entirely; otherwise scale by a precomputed 1/T (no full-tile divide).
        if temperature != 1.0:
            inv_t = jnp.float32(1.0 / temperature)
            xt, st = x * inv_t, s * inv_t
        else:
            xt, st = x, s

        # Student log-sum-exp (numerically stable).
        x_max = jnp.max(xt, axis=-1, keepdims=True)
        x_sh = xt - x_max                                                # [TB,C]
        x_lse = jnp.log(jnp.sum(jnp.exp(x_sh), axis=-1, keepdims=True))  # [TB,1]

        # Teacher softmax pieces.
        s_max = jnp.max(st, axis=-1, keepdims=True)
        s_sh = st - s_max                                                # [TB,C]
        es = jnp.exp(s_sh)                                               # [TB,C]
        denom = jnp.sum(es, axis=-1, keepdims=True)                      # [TB,1]
        log_denom = jnp.log(denom)                                       # [TB,1]

        # Folded KL per row:
        #   sum_c q*(log q - log p) = cross/denom + (x_lse - log_denom)
        # with cross = sum_c es*(s_sh - x_sh).  No log_p/q/log_q full tiles;
        # the exact reciprocal only touches the [TB,1] row sums.
        cross = jnp.sum(es * (s_sh - x_sh), axis=-1, keepdims=True)      # [TB,1]
        kl_rows = cross * pl.reciprocal(denom) + (x_lse - log_denom)     # [TB,1]

        if has_target:
            # cross_entropy(output, target) on UN-tempered logits.  With
            # T == 1.0, log_p[tgt] = x_sh[tgt] - x_lse, so reuse x_sh / x_lse.
            if temperature == 1.0:
                x_sh_raw, x_lse_raw = x_sh, x_lse
            else:
                m = jnp.max(x, axis=-1, keepdims=True)
                x_sh_raw = x - m
                x_lse_raw = jnp.log(jnp.sum(jnp.exp(x_sh_raw), axis=-1,
                                            keepdims=True))
            cls = jax.lax.broadcasted_iota(jnp.int32, x_sh_raw.shape, 1)
            tgt = tgt_ref[...]                                           # [TB,1]
            picked = jnp.sum(jnp.where(cls == tgt, x_sh_raw, 0.0),
                             axis=-1, keepdims=True) - x_lse_raw
            ce_rows = -picked                                            # [TB,1]

        if need_mask:
            # Ragged last row tile: there is no host-side padding copy, so edge
            # rows hold unspecified data -> select (never multiply) to keep
            # NaN/Inf out of the accumulators.
            row0 = (p * num_inner + i) * tile_rows
            rows = row0 + jax.lax.broadcasted_iota(jnp.int32, (tile_rows, 1), 0)
            valid = rows < batch
            kl_rows = jnp.where(valid, kl_rows, 0.0)
            if has_target:
                ce_rows = jnp.where(valid, ce_rows, 0.0)

        kl_acc[...] += jnp.sum(kl_rows, axis=0, keepdims=True)
        if has_target:
            ce_acc[...] += jnp.sum(ce_rows, axis=0, keepdims=True)

        @pl.when(i == pl.num_programs(1) - 1)
        def _finalize():
            inv_b = jnp.float32(1.0 / batch)
            kl = kl_acc[...] * inv_b
            if has_target:
                ce = ce_acc[...] * inv_b
                t2 = jnp.float32(temperature * temperature)
                loss_ref[...] = (jnp.float32(alpha) * t2 * kl
                                 + jnp.float32(1.0 - alpha) * ce)
            else:
                loss_ref[...] = kl

    return kernel


def kl_loss_soft(output, soft_logits, target=None, alpha=0.5, block_rows=None):
    """Pallas implementation of KLLossSoft.forward. Returns an f32 scalar."""
    assert output.ndim == 2 and output.shape == soft_logits.shape
    B, C = output.shape
    itemsize = jnp.dtype(output.dtype).itemsize

    gen = _tpu_generation()
    if gen >= 7:                      # v7x: 64 MiB VMEM per TC, 2 TensorCores.
        per_block_cap = 4 * 1024 * 1024
        vmem_limit = 48 * 1024 * 1024
        num_cores = 2
    elif gen in (5, 6):               # v5e/v6e: 128 MiB VMEM, 1 TensorCore.
        per_block_cap = 8 * 1024 * 1024
        vmem_limit = 96 * 1024 * 1024
        num_cores = 1
    else:                             # Unknown generation: conservative budgets.
        per_block_cap = 4 * 1024 * 1024
        vmem_limit = 48 * 1024 * 1024
        num_cores = 1

    # Sub-32-bit dtypes pack along sublanes: keep row tiles a multiple of the
    # packed-row granule (8 rows f32, 16 bf16, 32 int8/fp8).
    sublane = max(8, 32 // max(1, itemsize))

    # Row tile: as large as the per-input block budget allows (2 logit inputs
    # x 2 pipeline buffers + a few f32 [TB,C] temporaries stays well inside the
    # scoped VMEM limit after the KL folding above).
    row_bytes = max(1, C * itemsize)
    cap_rows = max(sublane, _round_down(per_block_cap // row_bytes, sublane))
    want = cap_rows if block_rows is None else block_rows
    tb = min(want, cap_rows, _round_up(B, sublane))
    tb = max(sublane, _round_down(tb, sublane))

    total_blocks = pl.cdiv(B, tb)

    # 2-way partial-sum split across the leading grid axis only on multi-core
    # (v7x) parts, and only when the row tiles split evenly; on single-TC
    # v5e/v6e it would just be a serial loop with extra init/finalize overhead.
    num_par = 2 if (num_cores >= 2 and total_blocks >= 2
                    and total_blocks % 2 == 0) else 1
    num_inner = total_blocks // num_par
    grid = (num_par, num_inner)
    need_mask = (total_blocks * tb != B)      # ragged last row tile (no host pad)

    row_map = lambda p, i: (p * num_inner + i, 0)
    inputs = [output, soft_logits]
    in_specs = [pl.BlockSpec((tb, C), row_map),
                pl.BlockSpec((tb, C), row_map)]
    scratch = [pltpu.VMEM((1, 1), jnp.float32)]          # running KL sum

    has_target = target is not None
    if has_target:
        inputs.append(target.astype(jnp.int32).reshape(B, 1))
        in_specs.append(pl.BlockSpec((tb, 1), row_map))
        scratch.append(pltpu.VMEM((1, 1), jnp.float32))  # running CE sum

    kernel = _make_kernel(batch=B, tile_rows=tb, num_inner=num_inner,
                          temperature=TEMPERATURE, alpha=float(alpha),
                          has_target=has_target, need_mask=need_mask)

    bytes_accessed = (2 * B * C * itemsize + (B * 4 if has_target else 0)
                      + num_par * 4)
    cost = pl.CostEstimate(flops=10 * B * C,
                           transcendentals=2 * B * C,
                           bytes_accessed=bytes_accessed)

    def _run(dim_sems):
        return pl.pallas_call(
            kernel,
            out_shape=jax.ShapeDtypeStruct((num_par, 1), jnp.float32),
            grid=grid,
            in_specs=in_specs,
            out_specs=pl.BlockSpec((1, 1), lambda p, i: (p, 0)),
            scratch_shapes=scratch,
            compiler_params=pltpu.CompilerParams(
                dimension_semantics=dim_sems,
                vmem_limit_bytes=vmem_limit),
            cost_estimate=cost,
        )(*inputs)

    arbitrary = getattr(pltpu, "ARBITRARY", "arbitrary")
    fallback = (arbitrary, arbitrary)
    if num_par > 1:
        # True megacore split on v7x: each TensorCore reduces its half of the
        # row tiles into its own partial output block.
        dim_sems = (getattr(pltpu, "CORE_PARALLEL", arbitrary), arbitrary)
    else:
        dim_sems = fallback

    try:
        partials = _run(dim_sems)
    except Exception:
        if dim_sems == fallback:
            raise
        partials = _run(fallback)

    # Per-core partials already carry the /batch, alpha, T^2 scaling (linear),
    # so the final loss is just their sum.
    return jnp.sum(partials)


def _reference(output, soft_logits, target=None, alpha=0.5):
    """Pure-JAX reference mirroring the PyTorch module."""
    x = output.astype(jnp.float32) / TEMPERATURE
    s = soft_logits.astype(jnp.float32) / TEMPERATURE
    log_p = jax.nn.log_softmax(x, axis=1)
    q = jax.nn.softmax(s, axis=1)
    kl = jnp.sum(q * (jnp.log(q) - log_p)) / output.shape[0]
    if target is None:
        return kl
    log_p_raw = jax.nn.log_softmax(output.astype(jnp.float32), axis=1)
    ce = -jnp.mean(jnp.take_along_axis(log_p_raw, target[:, None], axis=1))
    return alpha * TEMPERATURE ** 2 * kl + (1.0 - alpha) * ce


if __name__ == "__main__":
    key = jax.random.PRNGKey(0)
    k1, k2, k3, k4, k5 = jax.random.split(key, 5)

    # Path 1: KL + CE, batch not tile-aligned and small row tiles -> exercises
    # the multi-step grid, the ragged edge block and the jnp.where masking
    # (and the 2-way CORE_PARALLEL split when running on a multi-core part).
    B1, C1 = 28, 40
    out1 = jax.random.normal(k1, (B1, C1), dtype=jnp.float32) * 2.0
    soft1 = jax.random.normal(k2, (B1, C1), dtype=jnp.float32) * 2.0
    tgt1 = jax.random.randint(k3, (B1,), 0, C1, dtype=jnp.int32)
    loss1 = jax.block_until_ready(
        kl_loss_soft(out1, soft1, tgt1, alpha=0.3, block_rows=8))
    ref1 = _reference(out1, soft1, tgt1, alpha=0.3)
    assert jnp.allclose(loss1, ref1, rtol=1e-5, atol=1e-5), (loss1, ref1)

    # Path 2: KL only (target=None), default (budget-sized) tile -> one block.
    B2, C2 = 24, 32
    out2 = jax.random.normal(k4, (B2, C2), dtype=jnp.float32)
    soft2 = jax.random.normal(k5, (B2, C2), dtype=jnp.float32)
    loss2 = jax.block_until_ready(kl_loss_soft(out2, soft2))
    ref2 = _reference(out2, soft2)
    assert jnp.allclose(loss2, ref2, rtol=1e-5, atol=1e-5), (loss2, ref2)

    print("KERNEL_OK")
</pallas_src>

<mosaic_0001>
module attributes {stable_mosaic.version = 11 : i64} {
  func.func @kernel(%arg0: i32, %arg1: i32, %arg2: memref<8x40xf32, #tpu.memory_space<vmem>>, %arg3: memref<8x40xf32, #tpu.memory_space<vmem>>, %arg4: memref<8x1xi32, #tpu.memory_space<vmem>>, %arg5: memref<1x1xf32, #tpu.memory_space<vmem>>, %arg6: memref<1x1xf32, #tpu.memory_space<vmem>>, %arg7: memref<1x1xf32, #tpu.memory_space<vmem>>) attributes {dimension_semantics = [#tpu.dimension_semantics<arbitrary>, #tpu.dimension_semantics<arbitrary>], iteration_bounds = array<i64: 1, 4>, scalar_prefetch = 0 : i64, scratch_operands = 2 : i64, tpu.core_type = #tpu.core_type<tc>, window_params = [{transform_indices = @transform_0, window_bounds = array<i64: 8, 40>}, {transform_indices = @transform_1, window_bounds = array<i64: 8, 40>}, {transform_indices = @transform_2, window_bounds = array<i64: 8, 1>}, {transform_indices = @transform_3, window_bounds = array<i64: 1, 1>}]} {
    %c0_i32 = arith.constant 0 : i32
    %0 = arith.cmpi eq, %arg1, %c0_i32 : i32
    %1 = arith.extui %0 : i1 to i32
    %c0_i32_0 = arith.constant 0 : i32
    %2 = arith.cmpi ne, %1, %c0_i32_0 : i32
    scf.if %2 {
      %cst_26 = arith.constant 0.000000e+00 : f32
      %65 = vector.broadcast %cst_26 : f32 to vector<1x1xf32>
      %c0_27 = arith.constant 0 : index
      %c0_28 = arith.constant 0 : index
      %66 = vector.load %arg6[%c0_27, %c0_28] : memref<1x1xf32, #tpu.memory_space<vmem>>, vector<1x1xf32>
      tpu.vector_store %arg6[%c0_27, %c0_28], %65 {strides = array<i32>} : memref<1x1xf32, #tpu.memory_space<vmem>>, vector<1x1xf32>,
      %cst_29 = arith.constant 0.000000e+00 : f32
      %67 = vector.broadcast %cst_29 : f32 to vector<1x1xf32>
      %c0_30 = arith.constant 0 : index
      %c0_31 = arith.constant 0 : index
      %68 = vector.load %arg7[%c0_30, %c0_31] : memref<1x1xf32, #tpu.memory_space<vmem>>, vector<1x1xf32>
      tpu.vector_store %arg7[%c0_30, %c0_31], %67 {strides = array<i32>} : memref<1x1xf32, #tpu.memory_space<vmem>>, vector<1x1xf32>,
    } else {
    }
    %c0 = arith.constant 0 : index
    %c0_1 = arith.constant 0 : index
    %3 = vector.load %arg2[%c0, %c0_1] : memref<8x40xf32, #tpu.memory_space<vmem>>, vector<8x40xf32>
    %c0_2 = arith.constant 0 : index
    %c0_3 = arith.constant 0 : index
    %4 = vector.load %arg3[%c0_2, %c0_3] : memref<8x40xf32, #tpu.memory_space<vmem>>, vector<8x40xf32>
    %cst = arith.constant dense<0xFF800000> : vector<8xf32>
    %5 = vector.multi_reduction <maximumf>, %3, %cst [1] : vector<8x40xf32> to vector<8xf32>
    %6 = vector.shape_cast %5 : vector<8xf32> to vector<8x1xf32>
    %7 = vector.broadcast %6 : vector<8x1xf32> to vector<8x40xf32>
    %8 = arith.subf %3, %7 : vector<8x40xf32>
    %9 = math.exp %8 : vector<8x40xf32>
    %cst_4 = arith.constant dense<0.000000e+00> : vector<8xf32>
    %10 = vector.multi_reduction <add>, %9, %cst_4 [1] : vector<8x40xf32> to vector<8xf32>
    %11 = vector.shape_cast %10 : vector<8xf32> to vector<8x1xf32>
    %12 = math.log %11 : vector<8x1xf32>
    %cst_5 = arith.constant dense<0xFF800000> : vector<8xf32>
    %13 = vector.multi_reduction <maximumf>, %4, %cst_5 [1] : vector<8x40xf32> to vector<8xf32>
    %14 = vector.shape_cast %13 : vector<8xf32> to vector<8x1xf32>
    %15 = vector.broadcast %14 : vector<8x1xf32> to vector<8x40xf32>
    %16 = arith.subf %4, %15 : vector<8x40xf32>
    %17 = math.exp %16 : vector<8x40xf32>
    %cst_6 = arith.constant dense<0.000000e+00> : vector<8xf32>
    %18 = vector.multi_reduction <add>, %17, %cst_6 [1] : vector<8x40xf32> to vector<8xf32>
    %19 = vector.shape_cast %18 : vector<8xf32> to vector<8x1xf32>
    %20 = math.log %19 : vector<8x1xf32>
    %21 = arith.subf %16, %8 : vector<8x40xf32>
    %22 = arith.mulf %17, %21 : vector<8x40xf32>
    %cst_7 = arith.constant dense<0.000000e+00> : vector<8xf32>
    %23 = vector.multi_reduction <add>, %22, %cst_7 [1] : vector<8x40xf32> to vector<8xf32>
    %24 = vector.shape_cast %23 : vector<8xf32> to vector<8x1xf32>
    %25 = tpu.reciprocal %19 : vector<8x1xf32> -> vector<8x1xf32>
    %26 = arith.mulf %24, %25 : vector<8x1xf32>
    %27 = arith.subf %12, %20 : vector<8x1xf32>
    %28 = arith.addf %26, %27 : vector<8x1xf32>
    %29 = tpu.iota {dimensions = array<i32: 1>} : vector<8x40xi32>
    %c0_8 = arith.constant 0 : index
    %c0_9 = arith.constant 0 : index
    %30 = vector.load %arg4[%c0_8, %c0_9] : memref<8x1xi32, #tpu.memory_space<vmem>>, vector<8x1xi32>
    %31 = vector.broadcast %30 : vector<8x1xi32> to vector<8x40xi32>
    %32 = arith.cmpi eq, %29, %31 : vector<8x40xi32>
    %cst_10 = arith.constant 0.000000e+00 : f32
    %33 = vector.broadcast %cst_10 : f32 to vector<8x40xf32>
    %34 = arith.select %32, %8, %33 : vector<8x40xi1>, vector<8x40xf32>
    %cst_11 = arith.constant dense<0.000000e+00> : vector<8xf32>
    %35 = vector.multi_reduction <add>, %34, %cst_11 [1] : vector<8x40xf32> to vector<8xf32>
    %36 = vector.shape_cast %35 : vector<8xf32> to vector<8x1xf32>
    %37 = arith.subf %36, %12 : vector<8x1xf32>
    %cst_12 = arith.constant 0.000000e+00 : f32
    %38 = vector.broadcast %cst_12 : f32 to vector<8x1xf32>
    %39 = arith.subf %38, %37 : vector<8x1xf32>
    %c4_i32 = arith.constant 4 : i32
    %40 = arith.muli %arg0, %c4_i32 : i32
    %41 = arith.addi %40, %arg1 : i32
    %c8_i32 = arith.constant 8 : i32
    %42 = arith.muli %41, %c8_i32 : i32
    %43 = tpu.iota {dimensions = array<i32: 0>} : vector<8x1xi32>
    %44 = vector.broadcast %42 : i32 to vector<8x1xi32>
    %45 = arith.addi %44, %43 : vector<8x1xi32>
    %c28_i32 = arith.constant 28 : i32
    %46 = vector.broadcast %c28_i32 : i32 to vector<8x1xi32>
    %47 = arith.cmpi slt, %45, %46 : vector<8x1xi32>
    %cst_13 = arith.constant 0.000000e+00 : f32
    %48 = vector.broadcast %cst_13 : f32 to vector<8x1xf32>
    %49 = arith.select %47, %28, %48 : vector<8x1xi1>, vector<8x1xf32>
    %cst_14 = arith.constant 0.000000e+00 : f32
    %50 = vector.broadcast %cst_14 : f32 to vector<8x1xf32>
    %51 = arith.select %47, %39, %50 : vector<8x1xi1>, vector<8x1xf32>
    %c0_15 = arith.constant 0 : index
    %c0_16 = arith.constant 0 : index
    %52 = vector.load %arg6[%c0_15, %c0_16] : memref<1x1xf32, #tpu.memory_space<vmem>>, vector<1x1xf32>
    %cst_17 = arith.constant dense<0.000000e+00> : vector<1xf32>
    %53 = vector.multi_reduction <add>, %49, %cst_17 [0] : vector<8x1xf32> to vector<1xf32>
    %54 = vector.shape_cast %53 : vector<1xf32> to vector<1x1xf32>
    %55 = arith.addf %52, %54 : vector<1x1xf32>
    %c0_18 = arith.constant 0 : index
    %c0_19 = arith.constant 0 : index
    %56 = vector.load %arg6[%c0_18, %c0_19] : memref<1x1xf32, #tpu.memory_space<vmem>>, vector<1x1xf32>
    tpu.vector_store %arg6[%c0_18, %c0_19], %55 {strides = array<i32>} : memref<1x1xf32, #tpu.memory_space<vmem>>, vector<1x1xf32>,
    %c0_20 = arith.constant 0 : index
    %c0_21 = arith.constant 0 : index
    %57 = vector.load %arg7[%c0_20, %c0_21] : memref<1x1xf32, #tpu.memory_space<vmem>>, vector<1x1xf32>
    %cst_22 = arith.constant dense<0.000000e+00> : vector<1xf32>
    %58 = vector.multi_reduction <add>, %51, %cst_22 [0] : vector<8x1xf32> to vector<1xf32>
    %59 = vector.shape_cast %58 : vector<1xf32> to vector<1x1xf32>
    %60 = arith.addf %57, %59 : vector<1x1xf32>
    %c0_23 = arith.constant 0 : index
    %c0_24 = arith.constant 0 : index
    %61 = vector.load %arg7[%c0_23, %c0_24] : memref<1x1xf32, #tpu.memory_space<vmem>>, vector<1x1xf32>
    tpu.vector_store %arg7[%c0_23, %c0_24], %60 {strides = array<i32>} : memref<1x1xf32, #tpu.memory_space<vmem>>, vector<1x1xf32>,
    %c3_i32 = arith.constant 3 : i32
    %62 = arith.cmpi eq, %arg1, %c3_i32 : i32
    %63 = arith.extui %62 : i1 to i32
    %c0_i32_25 = arith.constant 0 : i32
    %64 = arith.cmpi ne, %63, %c0_i32_25 : i32
    scf.if %64 {
      %c0_26 = arith.constant 0 : index
      %c0_27 = arith.constant 0 : index
      %65 = vector.load %arg6[%c0_26, %c0_27] : memref<1x1xf32, #tpu.memory_space<vmem>>, vector<1x1xf32>
      %cst_28 = arith.constant 0.0357142873 : f32
      %66 = vector.broadcast %cst_28 : f32 to vector<1x1xf32>
      %67 = arith.mulf %65, %66 : vector<1x1xf32>
      %c0_29 = arith.constant 0 : index
      %c0_30 = arith.constant 0 : index
      %68 = vector.load %arg7[%c0_29, %c0_30] : memref<1x1xf32, #tpu.memory_space<vmem>>, vector<1x1xf32>
      %cst_31 = arith.constant 0.0357142873 : f32
      %69 = vector.broadcast %cst_31 : f32 to vector<1x1xf32>
      %70 = arith.mulf %68, %69 : vector<1x1xf32>
      %cst_32 = arith.constant 3.000000e-01 : f32
      %cst_33 = arith.constant 1.000000e+00 : f32
      %71 = arith.mulf %cst_32, %cst_33 : f32
      %72 = vector.broadcast %71 : f32 to vector<1x1xf32>
      %73 = arith.mulf %72, %67 : vector<1x1xf32>
      %cst_34 = arith.constant 0.699999988 : f32
      %74 = vector.broadcast %cst_34 : f32 to vector<1x1xf32>
      %75 = arith.mulf %74, %70 : vector<1x1xf32>
      %76 = arith.addf %73, %75 : vector<1x1xf32>
      %c0_35 = arith.constant 0 : index
      %c0_36 = arith.constant 0 : index
      %77 = vector.load %arg5[%c0_35, %c0_36] : memref<1x1xf32, #tpu.memory_space<vmem>>, vector<1x1xf32>
      tpu.vector_store %arg5[%c0_35, %c0_36], %76 {strides = array<i32>} : memref<1x1xf32, #tpu.memory_space<vmem>>, vector<1x1xf32>,
    } else {
    }
    return
  }
  func.func @transform_0(%arg0: i32, %arg1: i32) -> (i32, i32) {
    %c4_i32 = arith.constant 4 : i32
    %0 = arith.muli %arg0, %c4_i32 : i32
    %1 = arith.addi %0, %arg1 : i32
    %c0_i32 = arith.constant 0 : i32
    %c0_i32_0 = arith.constant 0 : i32
    return %1, %c0_i32 : i32, i32
  }
  func.func @transform_1(%arg0: i32, %arg1: i32) -> (i32, i32) {
    %c4_i32 = arith.constant 4 : i32
    %0 = arith.muli %arg0, %c4_i32 : i32
    %1 = arith.addi %0, %arg1 : i32
    %c0_i32 = arith.constant 0 : i32
    %c0_i32_0 = arith.constant 0 : i32
    return %1, %c0_i32 : i32, i32
  }
  func.func @transform_2(%arg0: i32, %arg1: i32) -> (i32, i32) {
    %c4_i32 = arith.constant 4 : i32
    %0 = arith.muli %arg0, %c4_i32 : i32
    %1 = arith.addi %0, %arg1 : i32
    %c0_i32 = arith.constant 0 : i32
    %c0_i32_0 = arith.constant 0 : i32
    return %1, %c0_i32 : i32, i32
  }
  func.func @transform_3(%arg0: i32, %arg1: i32) -> (i32, i32) {
    %c0_i32 = arith.constant 0 : i32
    %c0_i32_0 = arith.constant 0 : i32
    return %arg0, %c0_i32 : i32, i32
  }
}

</mosaic_0001>

<bundles_post_ra>
// kernel: tpu_custom_call.1
= control target key start
LH: loop header
LB: loop body
LE: loop exit
PB: predicated region body
PF: predicated region fallthrough
CT: control target
= control target key end

     0   :  { %8 = vsyncpa [#allocation5], 0  ;;  %s810_s0 = inlined_call_operand.vmem [shape: f32[28,40], index: 0, kind: input, shape index: {}]   ;;  %s811_s1 = inlined_call_operand.hbm [shape: f32[28,40], index: 1, kind: input, shape index: {}]   ;;  %s812_s2 = inlined_call_operand.vmem [shape: s32[28,1], index: 2, kind: input, shape index: {}]   ;;  %s813_s3 = inlined_call_operand.hbm [shape: f32[1,1], index: 3, kind: output, shape index: {}]  }
   0x1   :  { %10 = vsyncpa [#allocation5 + $0x1], 0 }
   0x2   :  { %11 = vsyncpa [#allocation6], 0  ;;  %s676_s12 = smov 0   ;;  %s678_s13 = smov 0  }
   0x3   :  { %s680_s14 = smov 0   ;;  %s682_s15 = smov 0  }
   0x4   :  { %s684_s16 = smov 0   ;;  %s686_s17 = smov 0  }
   0x5 LB: > { %s452_s18 = sadd.s32 4294967295, %s650_s17   ;;  %s26_s19 = sadd.s32 1, %s646_s16  ;;  %s650_s17 = sphi %s686_s17, %s17_s17   ;;  %s646_s16 = sphi %s684_s16, %s822_s16   ;;  %s642_s15 = sphi %s682_s15, %s821_s15   ;;  %s638_s14 = sphi %s680_s14, %s820_s14   ;;  %s634_s13 = sphi %s678_s13, %s819_s13   ;;  %s630_s12 = sphi %s676_s12, %s818_s12  }
   0x6   : > { %p27_p0 = scmp.ge.s32.totalorder %s26_s19, 4  ;;  %s70_s20 = sadd.s32 1, %s638_s14 }
   0x7   : > { %p77_p1 = scmp.ne.s32.totalorder %s638_s14, %s634_s13  ;;  %p78_p2 = scmp.eq.s32.totalorder %s650_s17, 0 }
   0x8   : > { %s824_s19 = smov (%p27_p0, %s26_s19), 0  ;;  %p83_p4 = scmp.ne.s32.totalorder %s634_s13, %s630_s12 }
   0x9   : > { %p712_p3 = por %p78_p2, %p77_p1  ;;  %s67_s22 = ssub.s32 %s646_s16, %s824_s19 }
   0xa   : > { %p84_p5 = scmp.eq.s32.totalorder %s452_s18, 0  ;;  %p68_p6 = scmp.eq.s32.totalorder %s67_s22, 0 }
   0xb   : > { %p478_p8 = scmp.lt.s32.totalorder %s650_s17, 4  ;;  %s174_s25 = sand.u32 1, %s638_s14  }
   0xc   : > { %p721_p7 = por %p84_p5, %p83_p4  ;;  %s456_s26 = sshll.u32 %s646_s16, 7 }
   0xd   : > { %s727_s24 = scalar_select %p68_p6, %s638_s14, %s70_s20  }
   0xe   : > { %s455_s27 = sshll.u32 %s174_s25, 3  ;;  %s185_s30 = scalar_lea.hbm %s811_s1, %s456_s26 }
   0xf   : > { %s178_s4 = scalar_lea.vmem [#allocation4], %s455_s27  ;;  %p736_p9 = pnand %p478_p8, %p712_p3 }
  0x10   : > { %s187_s5 = sshll.u32 %s178_s4, 4  ;;  %p457_p10 = scmp.ge.s32.totalorder %s650_s17, 1  ;;  %s188_s5 = int_to_ptr.vmem [resolvable:$true] %s187_s5 }
  0x11   : > { %p203_p11 = scmp.lt.s32.totalorder %s650_s17, 5  ;;  %s175_s7 = scalar_lea.sflag [#allocation5], %s174_s25 }
  0x12   : > { %p546_p12 = pneg %p736_p9  ;;  %s557_s8 = scalar_lea.vmem %s188_s5, 128 }
  0x13   : > { %p558_p13 = scmp.ne.s32.totalorder %s188_s5, %s557_s8  ;;  %s652_s9 = smov [#allocation4]  }
  0x14   : > { %s562_s10 = sshll.u32 %s652_s9, 4  ;;  %s563_s10 = int_to_ptr.vmem [resolvable:$false] %s562_s10 }
  0x15   : > { %p560_p0 = pnand %p558_p13, %p546_p12  ;;  %s564_s11 = scalar_lea.vmem %s563_s10, 256 }
  0x16   : > { %p565_p2 = scmp.lt.s32.totalorder %s188_s5, %s563_s10  ;;  %p566_p3 = scmp.lt.s32.totalorder %s564_s11, %s557_s8 }
  0x17   : > { %p561_p1 = pneg %p560_p0 }
  0x18   : > { %p567_p4 = por %p566_p3, %p565_p2 }
  0x1a   : > { %p568_p5 = pnand %p567_p4, %p561_p1 }
  0x1c   : > { %571 = shalt.err (!%p568_p5)
}
  0x1d   : > { %477 = dma.hbm_to_vmem [thread:$0]  (!%p736_p9), %s185_s30, 128, %s188_s5, %s175_s7  }
  0x1e   : > { %p204_p6 = pnand %p457_p10, %p203_p11 }
  0x1f   : > { %s209_s12 = sand.u32 (!%p204_p6), 1, %s634_s13  }
  0x20   : > { %207 = sbr.rel (%p204_p6) target bundleno = 414 (0x19e), region = 32  ;;  %s458_s20 = sshll.u32 (!%p204_p6), %s209_s12, 3 }
  0x21   : > { %s210_s21 = scalar_lea.sflag (!%p204_p6), [#allocation5], %s209_s12  ;;  %s213_s22 = scalar_lea.vmem (!%p204_p6), [#allocation4], %s458_s20 }
  0x25   : > { %621 = dma.done.wait (%p721_p7), %s210_s21, 128  }
  0x26   : > { %623 = vsyncadd (%p721_p7), %s210_s21, 4294967168  ;;  %p245_p8 = scmp.lt.s32.totalorder %s642_s15, 3  ;;  %p461_p9 = scmp.ne.s32.totalorder %s642_s15, 0 }
  0x28   : > { %s246_s25 = scalar_select %p245_p8, %s642_s15, 3 }
  0x29   : > { %264 = sbr.rel (%p461_p9) target bundleno = 48 (0x30), region = 40 }
  0x2a   : > { %s459_s26 = sshll.u32 %s246_s25, 3 }
  0x2b   : > { %s248_s29 = scalar_lea.vmem %s810_s0, %s459_s26  ;;  %s258_s5 = scalar_lea.vmem %s812_s2, %s459_s26 }
  0x2e   : > { %vm265_vm0 = vcmask 0   ;;  %v653_v0 = vmov 0.0  }
  0x2f   : > { %266 = vst.msk [vmem:[#allocation2] sm:$0x1] %vm265_vm0, %v653_v0  ;;  %267 = vst.msk [vmem:[#allocation3] sm:$0x1] %vm265_vm0, %v653_v0 }
  0x30 PF: > { %v268_v1 = vld [vmem:[%s248_s29] sm:$0xff]  ;;  %vm270_vm1 = vcmask 326656   ;;  %v654_v5 = vmov 0   ;;  %v302_v13 = vlaneseq  ;;  %s462_s23 = sshll.u32 %s642_s15, 3  ;;  %vm333_vm4 = vcmask 0   ;;  %p463_p7 = scmp.ne.s32.totalorder %s642_s15, 3 }
  0x31   : > { %v269_v2 = vld [vmem:[%s213_s22] sm:$0xff]  ;;  %v271_v4 = vsel %vm270_vm1, %v268_v1, -inf  ;;  %532 = vset.pattern.permute.xlu1 %v654_v5  ;;  %533 = vset.pattern.permute.xlu0 %v654_v5  ;;  %v320_v29 = vstv %s462_s23 }
  0x32   : > { %v304_v3 = vld [vmem:[%s258_s5] sm:$0xff]  ;;  %272 = vmax.xlane.f32.xlu0 %v271_v4  ;;  %v282_v6 = vsel %vm270_vm1, %v269_v2, -inf  ;;  %v303_v16 = vand.u32 127, %v302_v13  ;;  %v319_v28 = vshrl.u32 %v302_v13, 7 }
  0x33   : > { %306 = vperm.xlu1 %532, %v304_v3  }
  0x34   : > { %v321_v31 = vadd.s32 %v320_v29, %v319_v28 }
  0x36   : > { %283 = vmax.xlane.f32.xlu0 %v282_v6  ;;  %vm322_vm3 = vcmp.lt.s32.totalorder %v321_v31, 28  ;;  %v335_v52 = vld [vmem:[#allocation3] sm:$0x1]  ;;  %v325_v57 = vld [vmem:[#allocation2] sm:$0x1] }
  0xae   : > { %v307_v19 = vpop.permute.xlu1 %306 }
  0xaf   : > { %vm308_vm2 = vcmp.eq.s32.totalorder %v303_v16, %v307_v19 }
  0xbb   : > { %v273_v7 = vpop.xlane.xlu0 %272 }
  0xbc   : > { %v274_v8 = vsub.f32 %v268_v1, %v273_v7 }
  0xbe   : > { %v275_v9 = vmul.f32 1.442695, %v274_v8  ;;  %v309_v23 = vsel %vm308_vm2, %v274_v8, 0.0 }
  0xbf   : > { %v284_v10 = vpop.xlane.xlu0 %283  ;;  %v310_v24 = vsel %vm270_vm1, %v309_v23, 0.0 }
  0xc0   : > { %534 = vpow2.f32 %v275_v9  ;;  %v285_v11 = vsub.f32 %v269_v2, %v284_v10 }
  0xc2   : > { %v286_v12 = vmul.f32 1.442695, %v285_v11  ;;  %v293_v17 = vsub.f32 %v285_v11, %v274_v8 }
  0xc4   : > { %536 = vpow2.f32 %v286_v12 }
  0xcd   : > { %v535_v14 = vpop.eup %534 }
  0xce   : > { %v277_v15 = vsel %vm270_vm1, %v535_v14, 0.0 }
  0xcf   : > { %278 = vadd.xlane.f32.xlu1 %v277_v15 }
  0xd1   : > { %v537_v18 = vpop.eup %536 }
  0xd2   : > { %v288_v20 = vsel %vm270_vm1, %v537_v18, 0.0  ;;  %v294_v21 = vmul.f32 %v537_v18, %v293_v17 }
  0xd3   : > { %289 = vadd.xlane.f32.xlu0 %v288_v20 }
  0xd4   : > { %v295_v22 = vsel %vm270_vm1, %v294_v21, 0.0 }
  0xd7   : > { %296 = vadd.xlane.f32.xlu0 %v295_v22 }
  0xdb   : > { %311 = vadd.xlane.f32.xlu0 %v310_v24 }
 0x158   : > { %v279_v25 = vpop.xlane.xlu1 %278 }
 0x159   : > { %538 = vlog2.f32 %v279_v25 }
 0x15c   : > { %v290_v26 = vpop.xlane.xlu0 %289 }
 0x15d   : > { %540 = vlog2.f32 %v290_v26 }
 0x15e   : > { %542 = vrcp.f32 %v290_v26 }
 0x160   : > { %v297_v27 = vpop.xlane.xlu0 %296 }
 0x164   : > { %v312_v33 = vpop.xlane.xlu0 %311 }
 0x166   : > { %v539_v30 = vpop.eup %538 }
 0x167   : > { %v281_v32 = vmul.f32 0.6931472, %v539_v30 }
 0x169   : > { %v313_v34 = vsub.f32 %v312_v33, %v281_v32 }
 0x16a   : > { %v541_v35 = vpop.eup %540 }
 0x16b   : > { %v543_v36 = vpop.eup %542  ;;  %v292_v37 = vmul.f32 0.6931472, %v541_v35  ;;  %v314_v38 = vsub.f32 0.0, %v313_v34 }
 0x16c   : > { %v299_v40 = vmul.f32 %v543_v36, %v297_v27 }
 0x16d   : > { %v300_v39 = vsub.f32 %v281_v32, %v292_v37  ;;  %v324_v41 = vsel %vm322_vm3, %v314_v38, 0.0 }
 0x16e   : > { %v336_v42 = vrot.slane %v324_v41, 4 }
 0x16f   : > { %v301_v43 = vadd.f32 %v300_v39, %v299_v40 }
 0x170   : > { %v337_v44 = vadd.f32 %v336_v42, %v324_v41 }
 0x171   : > { %v323_v45 = vsel %vm322_vm3, %v301_v43, 0.0 }
 0x172   : > { %v326_v46 = vrot.slane %v323_v45, 4  ;;  %v338_v47 = vrot.slane %v337_v44, 2 }
 0x174   : > { %v327_v48 = vadd.f32 %v326_v46, %v323_v45  ;;  %v339_v49 = vadd.f32 %v338_v47, %v337_v44 }
 0x176   : > { %v328_v50 = vrot.slane %v327_v48, 2  ;;  %v340_v51 = vrot.slane %v339_v49, 1 }
 0x178   : > { %v329_v53 = vadd.f32 %v328_v50, %v327_v48  ;;  %v341_v54 = vadd.f32 %v340_v51, %v339_v49 }
 0x17a   : > { %v330_v55 = vrot.slane %v329_v53, 1  ;;  %v342_v56 = vadd.f32 %v341_v54, %v335_v52 }
 0x17c   : > { %v331_v58 = vadd.f32 %v330_v55, %v329_v53  ;;  %343 = vst.msk [vmem:[#allocation3] sm:$0x1] %vm333_vm4, %v342_v56  ;;  %347 = sbr.rel (%p463_p7) target bundleno = 399 (0x18f), region = 44 }
 0x17e   : > { %v332_v59 = vadd.f32 %v331_v58, %v325_v57 }
 0x180   : > { %334 = vst.msk [vmem:[#allocation2] sm:$0x1] %vm333_vm4, %v332_v59 }
 0x183   : > { %v350_v61 = vld [vmem:[#allocation3] sm:$0x1] }
 0x184   : > { %v351_v63 = vmul.f32 0.035714287, %v350_v61 }
 0x186   : > { %v353_v1 = vmul.f32 0.7, %v351_v63 }
 0x187   : > { %v348_v60 = vld [vmem:[#allocation2] sm:$0x1] }
 0x188   : > { %v349_v62 = vmul.f32 0.035714287, %v348_v60 }
 0x18a   : > { %v352_v0 = vmul.f32 0.3, %v349_v62 }
 0x18c   : > { %v354_v2 = vadd.f32 %v353_v1, %v352_v0 }
 0x18e   : > { %355 = vst.msk [vmem:[#allocation7] sm:$0x1] %vm333_vm4, %v354_v2 }
 0x18f PF: > { %p777_p10 = scmp.eq.s32.totalorder %s452_s18, 3  ;;  %s655_s7 = smov [#allocation7]  }
 0x190   : > { %s365_s15 = sshll.u32 %s655_s7, 4  ;;  %s366_s15 = int_to_ptr.vmem [resolvable:$true] %s365_s15 }
 0x191   : > { %s572_s8 = scalar_lea.vmem %s366_s15, 16  ;;  %s578_s9 = scalar_lea.vmem %s366_s15, 32 }
 0x192   : > { %p573_p11 = scmp.ne.s32.totalorder %s366_s15, %s572_s8  ;;  %p579_p0 = scmp.lt.s32.totalorder %s366_s15, %s366_s15 }
 0x193   : > { %p580_p1 = scmp.lt.s32.totalorder %s578_s9, %s572_s8 }
 0x194   : > { %p574_p12 = pnand %p573_p11, %p777_p10 }
 0x195   : > { %p581_p2 = por %p580_p1, %p579_p0 }
 0x196   : > { %p575_p13 = pneg %p574_p12 }
 0x198   : > { %p582_p3 = pnand %p581_p2, %p575_p13 }
 0x19a   : > { %585 = shalt.err (!%p582_p3)
}
 0x19b   : > { %471 = dma.vmem_to_hbm [thread:$0]  (%p777_p10), %s366_s15, 16, %s813_s3, [#allocation6]  }
 0x19c   : > { %625 = dma.done.wait (%p777_p10), [#allocation6], 16  }
 0x19d   : > { %627 = vsyncadd (%p777_p10), [#allocation6], 4294967280 }
 0x19e PF: > { %s17_s17 = sadd.s32 1, %s650_s17   ;;  %s818_s12 = smov %s634_s13 }
 0x19f   : > { %p14_p4 = scmp.ge.s32.totalorder %s17_s17, 6   ;;  %s819_s13 = smov %s638_s14 }
 0x1a0   : > { %s820_s14 = smov %s727_s24  ;;  %s821_s15 = smov %s646_s16 }
 0x1a1   : > { %s822_s16 = smov %s824_s19  ;;  %16 = sbr.rel (!%p14_p4) target bundleno = 5 (0x5), region = 84 }
 0x1a6   :  { %378 = vsyncpa [#allocation5], 1 }
 0x1a7   :  { %380 = vsyncpa [#allocation5 + $0x1], 1 }
 0x1a8   :  { %381 = vsyncpa [#allocation6], 1 }
 0x1a9   :  { %383 = vsyncpa [#allocation6 + $0x1], 1 }

</bundles_post_ra>
